<compile_context>
chip_gen: v7x
topology: tpu7x:2x2x1
jax: 0.10.0
libtpu: 0.0.40
codegen_flags: <defaults>
</compile_context>

<pallas_src>
import jax
import jax.numpy as jnp
from jax.experimental import pallas as pl
from jax.experimental.pallas import tpu as pltpu


def satsimplenet7_kernel(xT_ref, w1T_ref, b1_ref, w2T_ref, b2_ref, oT_ref):
    # Hidden layer (transposed): (50,7) @ (7,TB) + (50,1) -> tanh
    h = jnp.dot(w1T_ref[...], xT_ref[...], preferred_element_type=jnp.float32)
    h = jnp.tanh(h + b1_ref[...])                      # bias broadcasts over lanes
    # Output layer (transposed): (3,50) @ (50,TB) + (3,1)
    y = jnp.dot(w2T_ref[...], h, preferred_element_type=jnp.float32)
    oT_ref[...] = (y + b2_ref[...]).astype(oT_ref.dtype)


def satsimplenet7_forward(x, w1T, b1, w2T, b2, *, tb=512):
    """Forward pass of SatSimpleNet_7.

    x   : (B, 7)  f32   input rows (PyTorch layout)
    w1T : (50, 7) f32   linear1.weight (PyTorch layout: out_features x in_features)
    b1  : (50, 1) f32   linear1.bias as a column
    w2T : (3, 50) f32   linear2.weight
    b2  : (3, 1)  f32   linear2.bias as a column
    returns (B, 3)

    tb: batch tile on the lane axis (multiple of 128). 512 already reaches ~85% of
    HBM roofline; bump to 2048-8192 for very large B (still v7x VMEM-safe).
    """
    B = x.shape[0]
    n_tiles = pl.cdiv(B, tb)
    B_pad = n_tiles * tb

    # Batch-on-lanes layout; pad batch up to a whole number of tiles so no block
    # is ragged (VMEM refs have no runtime bounds check).
    xT = x.T  # (7, B)
    if B_pad != B:
        xT = jnp.pad(xT, ((0, 0), (0, B_pad - B)))

    outT = pl.pallas_call(
        satsimplenet7_kernel,
        out_shape=jax.ShapeDtypeStruct((3, B_pad), x.dtype),
        grid_spec=pl.GridSpec(
            grid=(n_tiles,),
            in_specs=[
                pl.BlockSpec((7, tb), lambda i: (0, i)),     # x tile (batch-tiled)
                pl.BlockSpec((50, 7), lambda i: (0, 0)),     # w1 resident
                pl.BlockSpec((50, 1), lambda i: (0, 0)),     # b1 resident
                pl.BlockSpec((3, 50), lambda i: (0, 0)),     # w2 resident
                pl.BlockSpec((3, 1), lambda i: (0, 0)),      # b2 resident
            ],
            out_specs=pl.BlockSpec((3, tb), lambda i: (0, i)),
        ),
        compiler_params=pltpu.CompilerParams(
            # Batch tiles are independent -> let v7x shard them across its 2 TCs.
            dimension_semantics=("parallel",)
        ),
    )(xT, w1T, b1, w2T, b2)

    return outT[:, :B].T  # (B, 3)


def init_params(key):
    """Deterministic init mimicking nn.Linear's uniform(-1/sqrt(fan_in), 1/sqrt(fan_in)).

    Weights are stored in PyTorch layout (out_features, in_features); biases as columns.
    """
    k1, k2, k3, k4 = jax.random.split(key, 4)
    bound1 = 1.0 / jnp.sqrt(7.0)
    bound2 = 1.0 / jnp.sqrt(50.0)
    w1T = jax.random.uniform(k1, (50, 7), jnp.float32, -bound1, bound1)
    b1 = jax.random.uniform(k2, (50, 1), jnp.float32, -bound1, bound1)
    w2T = jax.random.uniform(k3, (3, 50), jnp.float32, -bound2, bound2)
    b2 = jax.random.uniform(k4, (3, 1), jnp.float32, -bound2, bound2)
    return w1T, b1, w2T, b2


if __name__ == "__main__":
    key = jax.random.PRNGKey(0)
    kx, kp = jax.random.split(key)

    B = 8  # small example batch (kernel itself scales to arbitrary B via tiling)
    x = jax.random.normal(kx, (B, 7), jnp.float32)
    w1T, b1, w2T, b2 = init_params(kp)

    out = satsimplenet7_forward(x, w1T, b1, w2T, b2)
    out = jax.block_until_ready(out)

    # Pure-JAX reference of the forward-pass semantics (standard PyTorch math).
    ref = jnp.tanh(x @ w1T.T + b1.reshape(1, 50)) @ w2T.T + b2.reshape(1, 3)
    assert out.shape == (B, 3)
    assert jnp.allclose(out, ref, atol=1e-4, rtol=1e-4), "mismatch vs reference"

    print("KERNEL_OK")
</pallas_src>

<mosaic_0001>
module attributes {stable_mosaic.version = 11 : i64} {
  func.func @satsimplenet7_kernel(%arg0: i32, %arg1: memref<7x512xf32, #tpu.memory_space<vmem>>, %arg2: memref<50x7xf32, #tpu.memory_space<vmem>>, %arg3: memref<50x1xf32, #tpu.memory_space<vmem>>, %arg4: memref<3x50xf32, #tpu.memory_space<vmem>>, %arg5: memref<3x1xf32, #tpu.memory_space<vmem>>, %arg6: memref<3x512xf32, #tpu.memory_space<vmem>>) attributes {dimension_semantics = [#tpu.dimension_semantics<parallel>], iteration_bounds = array<i64: 1>, scalar_prefetch = 0 : i64, scratch_operands = 0 : i64, tpu.core_type = #tpu.core_type<tc>, window_params = [{transform_indices = @transform_0, window_bounds = array<i64: 7, 512>}, {pipeline_mode = #tpu.pipeline_mode<synchronous>, transform_indices = @transform_1, window_bounds = array<i64: 50, 7>}, {pipeline_mode = #tpu.pipeline_mode<synchronous>, transform_indices = @transform_2, window_bounds = array<i64: 50, 1>}, {pipeline_mode = #tpu.pipeline_mode<synchronous>, transform_indices = @transform_3, window_bounds = array<i64: 3, 50>}, {pipeline_mode = #tpu.pipeline_mode<synchronous>, transform_indices = @transform_4, window_bounds = array<i64: 3, 1>}, {transform_indices = @transform_5, window_bounds = array<i64: 3, 512>}]} {
    %c0 = arith.constant 0 : index
    %c0_0 = arith.constant 0 : index
    %0 = vector.load %arg2[%c0, %c0_0] : memref<50x7xf32, #tpu.memory_space<vmem>>, vector<50x7xf32>
    %c0_1 = arith.constant 0 : index
    %c0_2 = arith.constant 0 : index
    %1 = vector.load %arg1[%c0_1, %c0_2] : memref<7x512xf32, #tpu.memory_space<vmem>>, vector<7x512xf32>
    %cst = arith.constant dense<0.000000e+00> : vector<50x512xf32>
    %2 = tpu.matmul %0, %1, %cst {dimension_numbers = #tpu.dot_dimension_numbers<[1], [0], [0], [1], [0, 0, 1, 1], [], []>} : vector<50x7xf32>, vector<7x512xf32>, vector<50x512xf32> -> vector<50x512xf32>
    %c0_3 = arith.constant 0 : index
    %c0_4 = arith.constant 0 : index
    %3 = vector.load %arg3[%c0_3, %c0_4] : memref<50x1xf32, #tpu.memory_space<vmem>>, vector<50x1xf32>
    %4 = vector.broadcast %3 : vector<50x1xf32> to vector<50x512xf32>
    %5 = arith.addf %2, %4 : vector<50x512xf32>
    %6 = math.tanh %5 : vector<50x512xf32>
    %c0_5 = arith.constant 0 : index
    %c0_6 = arith.constant 0 : index
    %7 = vector.load %arg4[%c0_5, %c0_6] : memref<3x50xf32, #tpu.memory_space<vmem>>, vector<3x50xf32>
    %cst_7 = arith.constant dense<0.000000e+00> : vector<3x512xf32>
    %8 = tpu.matmul %7, %6, %cst_7 {dimension_numbers = #tpu.dot_dimension_numbers<[1], [0], [0], [1], [0, 0, 1, 1], [], []>} : vector<3x50xf32>, vector<50x512xf32>, vector<3x512xf32> -> vector<3x512xf32>
    %c0_8 = arith.constant 0 : index
    %c0_9 = arith.constant 0 : index
    %9 = vector.load %arg5[%c0_8, %c0_9] : memref<3x1xf32, #tpu.memory_space<vmem>>, vector<3x1xf32>
    %10 = vector.broadcast %9 : vector<3x1xf32> to vector<3x512xf32>
    %11 = arith.addf %8, %10 : vector<3x512xf32>
    %c0_10 = arith.constant 0 : index
    %c0_11 = arith.constant 0 : index
    %12 = vector.load %arg6[%c0_10, %c0_11] : memref<3x512xf32, #tpu.memory_space<vmem>>, vector<3x512xf32>
    tpu.vector_store %arg6[%c0_10, %c0_11], %11 {strides = array<i32>} : memref<3x512xf32, #tpu.memory_space<vmem>>, vector<3x512xf32>,
    return
  }
  func.func @transform_0(%arg0: i32) -> (i32, i32) {
    %c0_i32 = arith.constant 0 : i32
    %c0_i32_0 = arith.constant 0 : i32
    return %c0_i32, %arg0 : i32, i32
  }
  func.func @transform_1(%arg0: i32) -> (i32, i32) {
    %c0_i32 = arith.constant 0 : i32
    %c0_i32_0 = arith.constant 0 : i32
    %c0_i32_1 = arith.constant 0 : i32
    return %c0_i32, %c0_i32_0 : i32, i32
  }
  func.func @transform_2(%arg0: i32) -> (i32, i32) {
    %c0_i32 = arith.constant 0 : i32
    %c0_i32_0 = arith.constant 0 : i32
    %c0_i32_1 = arith.constant 0 : i32
    return %c0_i32, %c0_i32_0 : i32, i32
  }
  func.func @transform_3(%arg0: i32) -> (i32, i32) {
    %c0_i32 = arith.constant 0 : i32
    %c0_i32_0 = arith.constant 0 : i32
    %c0_i32_1 = arith.constant 0 : i32
    return %c0_i32, %c0_i32_0 : i32, i32
  }
  func.func @transform_4(%arg0: i32) -> (i32, i32) {
    %c0_i32 = arith.constant 0 : i32
    %c0_i32_0 = arith.constant 0 : i32
    %c0_i32_1 = arith.constant 0 : i32
    return %c0_i32, %c0_i32_0 : i32, i32
  }
  func.func @transform_5(%arg0: i32) -> (i32, i32) {
    %c0_i32 = arith.constant 0 : i32
    %c0_i32_0 = arith.constant 0 : i32
    return %c0_i32, %arg0 : i32, i32
  }
}

</mosaic_0001>

<bundles_post_ra>
// kernel: tpu_custom_call.1
= control target key start
LH: loop header
LB: loop body
LE: loop exit
PB: predicated region body
PF: predicated region fallthrough
CT: control target
= control target key end

     0   :  { %vm96_vm0 = vcmask 1046528   ;;  %vm74_vm1 = vcmask 56320   ;;  %v674_v5 = vmov 0.0   ;;  %v675_v9 = vmov 0   ;;  %s793_s0 = inlined_call_operand.vmem [shape: f32[7,512], index: 0, kind: input, shape index: {}]   ;;  %s794_s1 = inlined_call_operand.vmem [shape: f32[50,7], index: 1, kind: input, shape index: {}]   ;;  %s795_s2 = inlined_call_operand.vmem [shape: f32[50,1], index: 2, kind: input, shape index: {}]   ;;  %s796_s3 = inlined_call_operand.vmem [shape: f32[3,50], index: 3, kind: input, shape index: {}]   ;;  %s797_s4 = inlined_call_operand.vmem [shape: f32[3,1], index: 4, kind: input, shape index: {}]   ;;  %s798_s5 = inlined_call_operand.hbm [shape: f32[3,512], index: 5, kind: output, shape index: {}]  }
   0x1   :  { %v29_v0 = vld [vmem:[%s793_s0 + $0x8] sm:$0x7f]  ;;  %v31_v1 = vld [vmem:[%s793_s0 + $0x18] sm:$0x7f]  ;;  %v28_v2 = vld [vmem:[%s793_s0] sm:$0x7f]  ;;  %173 = vmatprep.mubr.f32.mxu0 %v674_v5  ;;  %280 = vmatprep.mubr.f32.mxu1 %v674_v5 }
   0x2   :  { %541 = vmatprep.subr.msk.mxu0 %vm96_vm0, %v29_v0  ;;  %550 = vmatprep.subr.msk.mxu1 %vm96_vm0, %v31_v1  ;;  %v30_v3 = vld [vmem:[%s793_s0 + $0x10] sm:$0x7f]  ;;  %v21_v4 = vld [vmem:[%s794_s1] sm:$0xff]  ;;  %v22_v8 = vld [vmem:[%s794_s1 + $0x8] sm:$0xff] }
   0x3   :  { %542 = vmatpush1.msk.msra.mxu0 %vm96_vm0, %v28_v2  ;;  %551 = vmatpush1.msk.msra.mxu1 %vm96_vm0, %v30_v3  ;;  %v32_v6 = vld [vmem:[%s795_s2] sm:$0xff]  ;;  %v34_v7 = vld [vmem:[%s795_s2 + $0x10] sm:$0xff] }
   0x4   :  { %543 = vmatmul.mubr.msk.f32.vlgmr.msra.gmra.mrb[0].mxu0 %vm74_vm1, %v21_v4  ;;  %552 = vmatmul.mubr.msk.f32.vlgmr.msra.gmra.mrb[0].mxu1 %vm74_vm1, %v21_v4 }
   0x5   :  { %179 = vmatprep.mubr.f32.mxu0 %v674_v5  ;;  %286 = vmatprep.mubr.f32.mxu1 %v674_v5 }
   0x6   :  { %592 = vset.pattern.permute.xlu0 %v675_v9  ;;  %593 = vset.pattern.permute.xlu1 %v675_v9 }
   0x7   :  { %10 = vsyncpa [#allocation3], 0  ;;  %41 = vperm.xlu0 %592, %v32_v6   ;;  %51 = vperm.xlu1 %593, %v34_v7   ;;  %v33_v10 = vld [vmem:[%s795_s2 + $0x8] sm:$0xff]  ;;  %v35_v11 = vld [vmem:[%s795_s2 + $0x18] sm:$0xff]  ;;  %vm362_vm2 = vcmask 1041408   ;;  %vm358_vm3 = vcmask 408576  }
   0x8   :  { %544 = vmatmul.mubr.msk.f32.gmra.mrb[2].mxu0 %vm74_vm1, %v22_v8  ;;  %553 = vmatmul.mubr.msk.f32.gmra.mrb[2].mxu1 %vm74_vm1, %v22_v8  ;;  %v23_v12 = vld [vmem:[%s794_s1 + $0x10] sm:$0xff]  ;;  %v36_v13 = vld [vmem:[%s795_s2 + $0x20] sm:$0xff]  ;;  %v37_v14 = vld [vmem:[%s795_s2 + $0x28] sm:$0xff]  ;;  %s676_s29 = smov [#allocation2]  }
   0x9   :  { %185 = vmatprep.mubr.f32.mxu0 %v674_v5  ;;  %292 = vmatprep.mubr.f32.mxu1 %v674_v5  ;;  %v24_v15 = vld [vmem:[%s794_s1 + $0x18] sm:$0xff]  ;;  %v38_v16 = vld [vmem:[%s795_s2 + $0x30] sm:$0x3]  ;;  %v352_v17 = vld [vmem:[%s797_s4] sm:$0x7]  ;;  %s533_s30 = sshll.u32 %s676_s29, 4  ;;  %s534_s30 = int_to_ptr.vmem [resolvable:$true] %s533_s30 }
   0xa   :  { %v25_v18 = vld [vmem:[%s794_s1 + $0x20] sm:$0xff]  ;;  %v26_v19 = vld [vmem:[%s794_s1 + $0x28] sm:$0xff]  ;;  %v27_v20 = vld [vmem:[%s794_s1 + $0x30] sm:$0x3]  ;;  %p655_p1 = scmp.lt.s32.totalorder %s534_s30, %s534_s30 }
   0xb   :  { %46 = vperm.xlu0 %592, %v33_v10   ;;  %56 = vperm.xlu1 %593, %v35_v11  }
   0xc   :  { %545 = vmatmul.mubr.msk.f32.gmra.mrb[4].mxu0 %vm74_vm1, %v23_v12  ;;  %554 = vmatmul.mubr.msk.f32.gmra.mrb[4].mxu1 %vm74_vm1, %v23_v12 }
   0xd   :  { %191 = vmatprep.mubr.f32.mxu0 %v674_v5  ;;  %298 = vmatprep.mubr.f32.mxu1 %v674_v5 }
   0xf   :  { %61 = vperm.xlu0 %592, %v36_v13   ;;  %66 = vperm.xlu1 %593, %v37_v14  }
  0x10   :  { %546 = vmatmul.mubr.msk.f32.gmra.mrb[6].mxu0 %vm74_vm1, %v24_v15  ;;  %555 = vmatmul.mubr.msk.f32.gmra.mrb[6].mxu1 %vm74_vm1, %v24_v15 }
  0x11   :  { %197 = vmatprep.mubr.f32.mxu0 %v674_v5  ;;  %304 = vmatprep.mubr.f32.mxu1 %v674_v5 }
  0x13   :  { %71 = vperm.xlu0 %592, %v38_v16   ;;  %355 = vperm.xlu1 %593, %v352_v17  }
  0x14   :  { %547 = vmatmul.mubr.msk.f32.gmra.mrb[8].mxu0 %vm74_vm1, %v25_v18  ;;  %556 = vmatmul.mubr.msk.f32.gmra.mrb[8].mxu1 %vm74_vm1, %v25_v18 }
  0x15   :  { %203 = vmatprep.mubr.f32.mxu0 %v674_v5  ;;  %310 = vmatprep.mubr.f32.mxu1 %v674_v5 }
  0x18   :  { %548 = vmatmul.mubr.msk.f32.gmra.mrb[10].mxu0 %vm74_vm1, %v26_v19  ;;  %557 = vmatmul.mubr.msk.f32.gmra.mrb[10].mxu1 %vm74_vm1, %v26_v19 }
  0x19   :  { %209 = vmatprep.mubr.f32.mxu0 %v674_v5  ;;  %316 = vmatprep.mubr.f32.mxu1 %v674_v5 }
  0x1c   :  { %549 = vmatmul.mubr.msk.f32.gmra.mrb[12].mxu0 %vm74_vm1, %v27_v20  ;;  %558 = vmatmul.mubr.msk.f32.gmra.mrb[12].mxu1 %vm74_vm1, %v27_v20 }
  0x1d   :  { %439 = vmatprep.mubr.f32.mxu0 %v674_v5  ;;  %510 = vmatprep.mubr.f32.mxu1 %v674_v5 }
  0x86   :  { %v42_v21 = vpop.permute.xlu0 %41  ;;  %v52_v31 = vpop.permute.xlu1 %51 }
  0x8a   :  { %v47_v30 = vpop.permute.xlu0 %46  ;;  %v57_v48 = vpop.permute.xlu1 %56 }
  0x8e   :  { %v62_v60 = vpop.permute.xlu0 %61  ;;  %v67_v10 = vpop.permute.xlu1 %66 }
  0xd7   :  { %v175_v22 = vpop.f32.mrb[0].mxu0  ;;  %v282_v23 = vpop.f32.mrb[0].mxu1 }
  0xd8   :  { %v176_v24 = vadd.f32 %v175_v22, %v42_v21  ;;  %v283_v25 = vadd.f32 %v282_v23, %v42_v21  ;;  %v177_v26 = vpop.f32.mrb[1].mxu0  ;;  %v284_v27 = vpop.f32.mrb[1].mxu1 }
  0xd9   :  { %v178_v28 = vadd.f32 %v177_v26, %v42_v21  ;;  %v285_v29 = vadd.f32 %v284_v27, %v42_v21  ;;  %v72_v26 = vpop.permute.xlu0 %71 }
  0xda   :  { %594 = vtanh.f32 %v176_v24 }
  0xdb   :  { %596 = vtanh.f32 %v283_v25  ;;  %v181_v32 = vpop.f32.mrb[2].mxu0  ;;  %v288_v33 = vpop.f32.mrb[2].mxu1 }
  0xdc   :  { %598 = vtanh.f32 %v178_v28  ;;  %v182_v34 = vadd.f32 %v181_v32, %v47_v30  ;;  %v289_v35 = vadd.f32 %v288_v33, %v47_v30  ;;  %v183_v36 = vpop.f32.mrb[3].mxu0  ;;  %v290_v37 = vpop.f32.mrb[3].mxu1 }
  0xdd   :  { %600 = vtanh.f32 %v285_v29  ;;  %v184_v38 = vadd.f32 %v183_v36, %v47_v30  ;;  %v291_v39 = vadd.f32 %v290_v37, %v47_v30 }
  0xde   :  { %602 = vtanh.f32 %v182_v34 }
  0xdf   :  { %604 = vtanh.f32 %v289_v35  ;;  %v187_v40 = vpop.f32.mrb[4].mxu0  ;;  %v294_v41 = vpop.f32.mrb[4].mxu1 }
  0xe0   :  { %606 = vtanh.f32 %v184_v38  ;;  %v188_v42 = vadd.f32 %v187_v40, %v52_v31  ;;  %v295_v43 = vadd.f32 %v294_v41, %v52_v31  ;;  %v189_v44 = vpop.f32.mrb[5].mxu0  ;;  %v296_v45 = vpop.f32.mrb[5].mxu1 }
  0xe1   :  { %608 = vtanh.f32 %v291_v39  ;;  %v190_v46 = vadd.f32 %v189_v44, %v52_v31  ;;  %v297_v47 = vadd.f32 %v296_v45, %v52_v31 }
  0xe2   :  { %610 = vtanh.f32 %v188_v42 }
  0xe3   :  { %612 = vtanh.f32 %v295_v43  ;;  %v193_v49 = vpop.f32.mrb[6].mxu0  ;;  %v300_v50 = vpop.f32.mrb[6].mxu1 }
  0xe4   :  { %v595_v51 = vpop.eup %594  ;;  %614 = vtanh.f32 %v190_v46  ;;  %v194_v52 = vadd.f32 %v193_v49, %v57_v48  ;;  %v301_v53 = vadd.f32 %v300_v50, %v57_v48  ;;  %v195_v54 = vpop.f32.mrb[7].mxu0 }
  0xe5   :  { %v302_v55 = vpop.f32.mrb[7].mxu1  ;;  %v597_v56 = vpop.eup %596  ;;  %616 = vtanh.f32 %v297_v47  ;;  %v196_v57 = vadd.f32 %v195_v54, %v57_v48 }
  0xe6   :  { %v303_v58 = vadd.f32 %v302_v55, %v57_v48  ;;  %v599_v59 = vpop.eup %598  ;;  %618 = vtanh.f32 %v194_v52 }
  0xe7   :  { %v601_v61 = vpop.eup %600  ;;  %620 = vtanh.f32 %v301_v53  ;;  %v199_v62 = vpop.f32.mrb[8].mxu0 }
  0xe8   :  { %v306_v63 = vpop.f32.mrb[8].mxu1  ;;  %v603_v0 = vpop.eup %602  ;;  %622 = vtanh.f32 %v196_v57  ;;  %v200_v1 = vadd.f32 %v199_v62, %v62_v60 }
  0xe9   :  { %v307_v2 = vadd.f32 %v306_v63, %v62_v60  ;;  %v201_v3 = vpop.f32.mrb[9].mxu0  ;;  %v308_v4 = vpop.f32.mrb[9].mxu1  ;;  %624 = vtanh.f32 %v303_v58  ;;  %v567_v8 = vpack.c.bf16 %v603_v0, %v595_v51  ;;  %v351_v58 = vld [vmem:[%s796_s3] sm:$0x7]  ;;  %s650_s3 = scalar_lea.vmem %s534_s30, 256 }
  0xea   :  { %v605_v5 = vpop.eup %604  ;;  %v202_v6 = vadd.f32 %v201_v3, %v62_v60  ;;  %v309_v7 = vadd.f32 %v308_v4, %v62_v60  ;;  %626 = vtanh.f32 %v200_v1  ;;  %p651_p0 = scmp.ne.s32.totalorder %s534_s30, %s650_s3  ;;  %p656_p2 = scmp.lt.s32.totalorder %s650_s3, %s650_s3 }
  0xeb   :  { %v607_v9 = vpop.eup %606  ;;  %v579_v11 = vpack.c.bf16 %v605_v5, %v597_v56  ;;  %628 = vtanh.f32 %v307_v2  ;;  %v205_v13 = vpop.f32.mrb[10].mxu0 }
  0xec   :  { %v609_v12 = vpop.eup %608  ;;  %v312_v14 = vpop.f32.mrb[10].mxu1  ;;  %v565_v15 = vpack.c.bf16 %v607_v9, %v599_v59  ;;  %630 = vtanh.f32 %v202_v6  ;;  %v206_v17 = vadd.f32 %v205_v13, %v67_v10  ;;  %p657_p3 = por %p656_p2, %p655_p1 }
  0xed   :  { %v611_v16 = vpop.eup %610  ;;  %v313_v18 = vadd.f32 %v312_v14, %v67_v10  ;;  %v207_v19 = vpop.f32.mrb[11].mxu0  ;;  %v577_v21 = vpack.c.bf16 %v609_v12, %v601_v61  ;;  %632 = vtanh.f32 %v309_v7 }
  0xee   :  { %v314_v20 = vpop.f32.mrb[11].mxu1  ;;  %v613_v22 = vpop.eup %612  ;;  %v208_v23 = vadd.f32 %v207_v19, %v67_v10  ;;  %566 = vmatprep.subr.bf16.mxu0 %v565_v15  ;;  %634 = vtanh.f32 %v206_v17  ;;  %p658_p4 = pnand %p657_p3, %p651_p0 }
  0xef   :  { %v315_v24 = vadd.f32 %v314_v20, %v67_v10  ;;  %v615_v25 = vpop.eup %614  ;;  %578 = vmatprep.subr.bf16.mxu1 %v577_v21  ;;  %568 = vmatpush1.bf16.msra.mxu0 %v567_v8  ;;  %636 = vtanh.f32 %v313_v18  ;;  %v211_v28 = vpop.f32.mrb[12].mxu0 }
  0xf0   :  { %v617_v27 = vpop.eup %616  ;;  %580 = vmatpush1.bf16.msra.mxu1 %v579_v11  ;;  %v318_v29 = vpop.f32.mrb[12].mxu1  ;;  %638 = vtanh.f32 %v208_v23  ;;  %v212_v40 = vadd.f32 %v211_v28, %v72_v26 }
  0xf1   :  { %v619_v30 = vpop.eup %618  ;;  %v213_v31 = vpop.f32.mrb[13].mxu0  ;;  %640 = vtanh.f32 %v315_v24  ;;  %v319_v43 = vadd.f32 %v318_v29, %v72_v26 }
  0xf2   :  { %v320_v32 = vpop.f32.mrb[13].mxu1  ;;  %v621_v33 = vpop.eup %620  ;;  %v214_v34 = vadd.f32 %v213_v31, %v72_v26  ;;  %v571_v36 = vpack.c.bf16 %v619_v30, %v611_v16 }
  0xf3   :  { %v321_v35 = vadd.f32 %v320_v32, %v72_v26  ;;  %v623_v37 = vpop.eup %622  ;;  %v583_v38 = vpack.c.bf16 %v621_v33, %v613_v22  ;;  %v356_v61 = vpop.permute.xlu1 %355 }
  0xf4   :  { %v625_v39 = vpop.eup %624  ;;  %v569_v41 = vpack.c.bf16 %v623_v37, %v615_v25  ;;  %642 = vtanh.f32 %v214_v34 }
  0xf5   :  { %v627_v42 = vpop.eup %626  ;;  %v581_v44 = vpack.c.bf16 %v625_v39, %v617_v27  ;;  %644 = vtanh.f32 %v321_v35 }
  0xf6   :  { %v629_v45 = vpop.eup %628  ;;  %570 = vmatprep.subr.bf16.mxu0 %v569_v41  ;;  %646 = vtanh.f32 %v212_v40 }
  0xf7   :  { %v631_v46 = vpop.eup %630  ;;  %582 = vmatprep.subr.bf16.mxu1 %v581_v44  ;;  %572 = vmatpush1.bf16.msra.mxu0 %v571_v36  ;;  %648 = vtanh.f32 %v319_v43 }
  0xf8   :  { %v633_v47 = vpop.eup %632  ;;  %584 = vmatpush1.bf16.msra.mxu1 %v583_v38 }
  0xf9   :  { %v635_v48 = vpop.eup %634 }
  0xfa   :  { %v637_v49 = vpop.eup %636  ;;  %v575_v50 = vpack.c.bf16 %v635_v48, %v627_v42 }
  0xfb   :  { %v639_v51 = vpop.eup %638  ;;  %v587_v52 = vpack.c.bf16 %v637_v49, %v629_v45 }
  0xfc   :  { %v641_v53 = vpop.eup %640  ;;  %v573_v54 = vpack.c.bf16 %v639_v51, %v631_v46 }
  0xfd   :  { %v585_v55 = vpack.c.bf16 %v641_v53, %v633_v47 }
  0xfe   :  { %574 = vmatprep.subr.bf16.mxu0 %v573_v54  ;;  %v643_v56 = vpop.eup %642 }
  0xff   :  { %586 = vmatprep.subr.bf16.mxu1 %v585_v55  ;;  %576 = vmatpush1.bf16.msra.mxu0 %v575_v50  ;;  %v645_v57 = vpop.eup %644 }
 0x100   :  { %588 = vmatpush1.bf16.msra.mxu1 %v587_v52  ;;  %559 = vmatprep.subr.msk.mxu0 %vm362_vm2, %v643_v56  ;;  %v647_v59 = vpop.eup %646 }
 0x101   :  { %562 = vmatprep.subr.msk.mxu1 %vm362_vm2, %v645_v57  ;;  %v649_v60 = vpop.eup %648 }
 0x103   :  { %560 = vmatpush1.msk.msra.mxu0 %vm362_vm2, %v647_v59 }
 0x104   :  { %563 = vmatpush1.msk.msra.mxu1 %vm362_vm2, %v649_v60  ;;  %561 = vmatmul.mubr.msk.f32.vlgmr.msra.gmra.mrb[14].mxu0 %vm358_vm3, %v351_v58 }
 0x105   :  { %564 = vmatmul.mubr.msk.f32.vlgmr.msra.gmra.mrb[14].mxu1 %vm358_vm3, %v351_v58 }
 0x1d7   :  { %v441_v62 = vpop.f32.mrb[14].mxu0 }
 0x1d8   :  { %v442_v63 = vadd.f32 %v441_v62, %v356_v61  ;;  %v512_v0 = vpop.f32.mrb[14].mxu1  ;;  %v443_v1 = vpop.f32.mrb[15].mxu0 }
 0x1d9   :  { %v513_v2 = vadd.f32 %v512_v0, %v356_v61  ;;  %v444_v3 = vadd.f32 %v443_v1, %v356_v61  ;;  %v514_v4 = vpop.f32.mrb[15].mxu1 }
 0x1da   :  { %v515_v5 = vadd.f32 %v514_v4, %v356_v61 }
 0x1db   :  { %v521_v6 = vcombine.low %v442_v63, %v444_v3 }
 0x1dc   :  { %v522_v7 = vcombine.low %v513_v2, %v515_v5 }
 0x1dd   :  { %525 = vst [vmem:[#allocation2] sm:$0x77] %v521_v6 }
 0x1de   :  { %526 = vst [vmem:[#allocation2 + $0x8] sm:$0x77] %v522_v7 }
 0x1df   :  { %661 = shalt.err (!%p658_p4)
}
 0x1e0   :  { %s662_s7 = scalar_lea.hbm %s798_s5, 256 }
 0x1e1   :  { %p663_p5 = scmp.ne.s32.totalorder %s798_s5, %s662_s7  ;;  %p666_p6 = scmp.lt.u32.totalorder %s662_s7, %s798_s5 }
 0x1e3   :  { %p668_p7 = pnand %p666_p6, %p663_p5 }
 0x1e5   :  { %671 = shalt.err (!%p668_p7)
}
 0x1e6   :  { %536 = dma.vmem_to_hbm [thread:$0]  %s534_s30, 256, %s798_s5, [#allocation3]  }
 0x1e7   :  { %672 = dma.done.wait [#allocation3], 256  }
 0x1e8   :  { %673 = vsyncadd [#allocation3], 4294967040 }
 0x1e9   :  { %540 = vsyncpa [#allocation3], 1 }

</bundles_post_ra>
